<compile_context>
chip_gen: v6e
topology: v6e:2x2x1
jax: 0.10.0
libtpu: 0.0.40
codegen_flags: <defaults>
</compile_context>

<pallas_src>
import functools

import jax
import jax.numpy as jnp
from jax import lax
from jax.experimental import pallas as pl
from jax.experimental.pallas import tpu as pltpu


def _warp_kernel(def_ref, im_ref, out_ref, *, H, W, C, bf16_stage1):
    """Bilinear warp for one (batch-tile, pixel-tile) grid step.

    def_ref: (Bt, 2, T)    absolute sample coords (x, y); pixels on lanes
    im_ref : (Bt, C*W, H)  image, row k = c*W + x holds column x of channel c
    out_ref: (Bt, C, T)    warped output; channels on sublanes, pixels on lanes
    """
    Bt = out_ref.shape[0]
    T = out_ref.shape[2]

    d = def_ref[...]                                   # (Bt, 2, T)
    x = d[:, 0:1, :]                                   # (Bt, 1, T) abs column
    y = d[:, 1:2, :]                                   # (Bt, 1, T) abs row

    # floor + cheap clamp: taps outside [0,W)/[0,H) never match the iota and
    # contribute exactly zero (== zero-pad/clamp reference); the clamp only
    # protects the f32->i32 cast against huge deformations.
    x0 = jnp.clip(jnp.floor(x), -2.0, W + 1.0)
    y0 = jnp.clip(jnp.floor(y), -2.0, H + 1.0)
    wx0 = x0 + 1.0 - x            # weight of column x0  (== x1 - x in torch)
    wy0 = y0 + 1.0 - y            # weight of row    y0
    x0i = x0.astype(jnp.int32)
    y0i = y0.astype(jnp.int32)

    zero = jnp.float32(0.0)

    # Row (y) one-hot interpolation weights for the stage-1 contraction.
    row = lax.broadcasted_iota(jnp.int32, (1, H, 1), 1)            # (1, H, 1)
    wy = (jnp.where(row == y0i, wy0, zero)
          + jnp.where(row == y0i + 1, 1.0 - wy0, zero))            # (Bt, H, T)

    # Stage 1 (MXU): blend the two source rows for every (channel, column, pixel)
    #   r[b, c*W + x, t] = wy0*im[b, y0, x, c] + (1 - wy0)*im[b, y1, x, c]
    im = im_ref[...]
    if bf16_stage1:
        r = jnp.einsum('bky,byt->bkt', im.astype(jnp.bfloat16),
                       wy.astype(jnp.bfloat16),
                       preferred_element_type=jnp.float32)         # (Bt, C*W, T)
    else:
        r = jnp.einsum('bky,byt->bkt', im, wy,
                       preferred_element_type=jnp.float32)         # (Bt, C*W, T)

    # Stage 2 (VPU + sublane reduce): blend the two source columns and sum
    # over W.  Column weights are built once per pixel tile and broadcast
    # across channels (no concatenate, no selector matmul).
    col = lax.broadcasted_iota(jnp.int32, (1, 1, W, 1), 2)         # (1,1,W,1)
    x0i4 = x0i[:, :, None, :]                                      # (Bt,1,1,T)
    wx0_4 = wx0[:, :, None, :]
    wx = (jnp.where(col == x0i4, wx0_4, zero)
          + jnp.where(col == x0i4 + 1, 1.0 - wx0_4, zero))         # (Bt,1,W,T)

    r4 = r.reshape(Bt, C, W, T)                                    # (Bt,C,W,T)
    out_ref[...] = jnp.sum(r4 * wx, axis=2).astype(out_ref.dtype)  # (Bt,C,T)


def _round_up(v, m):
    return (v + m - 1) // m * m


def _vmem_bytes(Bt, C, H, W, T):
    """Rough per-step VMEM footprint: double-buffered blocks + kernel temps."""
    f32 = 4
    Tl = _round_up(T, 128)
    blocks = (2 * Bt * 8 * Tl                                   # coords block
              + 2 * Bt * _round_up(C * W, 8) * _round_up(H, 128)  # image block
              + 2 * Bt * _round_up(C, 8) * Tl)                  # output block
    temps = (Bt * _round_up(H, 8) * Tl                          # wy one-hot
             + 3 * Bt * C * _round_up(W, 8) * Tl                # r / r4*wx / partials
             + Bt * _round_up(W, 8) * Tl                        # wx one-hot
             + 4 * Bt * 8 * Tl)                                 # coord scalars
    return f32 * (blocks + temps)


def _pick_pixel_tile(HW, Bt, C, H, W, budget):
    """Largest multiple-of-128 pixel tile (<=1024) fitting `budget`.
    Prefers exact divisors of HW; otherwise the caller pads the pixel axis."""
    cap = (min(1024, max(HW, 128)) // 128) * 128
    for t in range(cap, 127, -128):
        if HW % t == 0 and _vmem_bytes(Bt, C, H, W, t) <= budget:
            return t
    if HW <= 1024 and _vmem_bytes(Bt, C, H, W, HW) <= budget:
        return HW                         # tiny / irregular image: one tile
    for t in range(cap, 127, -128):       # no divisor: pad HW in the wrapper
        if _vmem_bytes(Bt, C, H, W, t) <= budget:
            return t
    return 128


def spatial_transformation(moving_image, deformation_matrix, *, bf16_stage1=False):
    """Pallas equivalent of SpatialTransformation.forward.

    moving_image:       (B, H, W, C) float
    deformation_matrix: (B, H, W, 2) float
    returns:            (B, H, W, C) float32
    """
    B, H, W, C = moving_image.shape
    HW = H * W

    # ---- wrapper-side layout plumbing (no pad copy of the image, no gather) --
    # image -> (B, C*W, H): row k = c*W + x, lane axis = source row y.
    im_k = jnp.transpose(moving_image.astype(jnp.float32),
                         (0, 3, 2, 1)).reshape(B, C * W, H)
    # absolute sample coords (deformation + meshgrid), pixels on the lane axis.
    dm = deformation_matrix.astype(jnp.float32)
    x_abs = dm[..., 0] + jnp.arange(W, dtype=jnp.float32)[None, None, :]
    y_abs = dm[..., 1] + jnp.arange(H, dtype=jnp.float32)[None, :, None]
    def_k = jnp.stack([x_abs.reshape(B, HW), y_abs.reshape(B, HW)], axis=1)

    # ---- tiling -------------------------------------------------------------
    budget = 18 * 1024 * 1024            # per-step working-set target
    Bt = B if B <= 8 else 1
    T = _pick_pixel_tile(HW, Bt, C, H, W, budget)
    if Bt > 1 and _vmem_bytes(Bt, C, H, W, T) > budget:
        Bt = 1
        T = _pick_pixel_tile(HW, Bt, C, H, W, budget)

    # Ensure >=2 steps along a parallel grid axis when possible (v7x: 2 TCs).
    if (B // Bt) * (pl.cdiv(HW, T)) < 2:
        if B > 1:
            for cand in range(B // 2, 0, -1):
                if B % cand == 0:
                    Bt = cand
                    break
        elif T % 256 == 0:
            T //= 2

    HWp = _round_up(HW, T)               # pad pixel axis if T doesn't divide HW
    if HWp != HW:
        def_k = jnp.pad(def_k, ((0, 0), (0, 0), (0, HWp - HW)))
    assert B % Bt == 0 and HWp % T == 0

    vmem_limit = int(min(40 * 1024 * 1024,
                         max(16 * 1024 * 1024,
                             2 * _vmem_bytes(Bt, C, H, W, T))))

    kernel = functools.partial(_warp_kernel, H=H, W=W, C=C,
                               bf16_stage1=bf16_stage1)

    out = pl.pallas_call(
        kernel,
        out_shape=jax.ShapeDtypeStruct((B, C, HWp), jnp.float32),
        grid=(B // Bt, HWp // T),
        in_specs=[
            # coord tile follows the (batch-tile, pixel-tile) grid point
            pl.BlockSpec((Bt, 2, T), lambda ib, it: (ib, 0, it)),
            # image block depends only on the batch tile -> stays resident in
            # VMEM across all pixel tiles of that batch tile (no re-DMA)
            pl.BlockSpec((Bt, C * W, H), lambda ib, it: (ib, 0, 0)),
        ],
        out_specs=pl.BlockSpec((Bt, C, T), lambda ib, it: (ib, 0, it)),
        compiler_params=pltpu.CompilerParams(
            dimension_semantics=("parallel", "parallel"),
            vmem_limit_bytes=vmem_limit,
        ),
    )(def_k, im_k)

    out = out[:, :, :HW]
    return jnp.transpose(out.reshape(B, C, H, W), (0, 2, 3, 1))


def _reference(moving_image, deformation_matrix):
    """Pure-JAX mirror of the PyTorch forward (pad + clamp + gather)."""
    B, H, W, C = moving_image.shape
    Hp, Wp = H + 2, W + 2
    im = jnp.pad(moving_image.astype(jnp.float32),
                 ((0, 0), (1, 1), (1, 1), (0, 0)))
    dx = deformation_matrix[..., 0]
    dy = deformation_matrix[..., 1]
    xm = jnp.arange(W, dtype=jnp.float32)[None, None, :]
    ym = jnp.arange(H, dtype=jnp.float32)[None, :, None]
    x = dx + xm + 1.0
    y = dy + ym + 1.0
    x0 = jnp.floor(x); x1 = x0 + 1.0
    y0 = jnp.floor(y); y1 = y0 + 1.0
    x0 = jnp.clip(x0, 0.0, Wp - 1.0); x1 = jnp.clip(x1, 0.0, Wp - 1.0)
    y0 = jnp.clip(y0, 0.0, Hp - 1.0); y1 = jnp.clip(y1, 0.0, Hp - 1.0)
    dxw = x1 - x; dyw = y1 - y
    wa = dxw * dyw; wb = dxw * (1.0 - dyw)
    wc = (1.0 - dxw) * dyw; wd = (1.0 - dxw) * (1.0 - dyw)
    x0i = x0.astype(jnp.int32); x1i = x1.astype(jnp.int32)
    y0i = y0.astype(jnp.int32); y1i = y1.astype(jnp.int32)
    bidx = jnp.arange(B)[:, None, None]
    Ia = im[bidx, y0i, x0i]; Ib = im[bidx, y1i, x0i]
    Ic = im[bidx, y0i, x1i]; Id = im[bidx, y1i, x1i]
    return (wa[..., None] * Ia + wb[..., None] * Ib
            + wc[..., None] * Ic + wd[..., None] * Id)


if __name__ == "__main__":
    # SpatialTransformation has no learnable parameters; nothing to initialize.
    key = jax.random.PRNGKey(0)
    k1, k2 = jax.random.split(key)
    B, H, W, C = 2, 16, 16, 4
    moving = jax.random.normal(k1, (B, H, W, C), dtype=jnp.float32)
    deform = 3.0 * jax.random.normal(k2, (B, H, W, 2), dtype=jnp.float32)

    out = spatial_transformation(moving, deform)
    out = jax.block_until_ready(out)

    ref = _reference(moving, deform)
    assert out.shape == (B, H, W, C) and out.dtype == jnp.float32
    max_err = float(jnp.max(jnp.abs(out - ref)))
    if max_err < 5e-4:
        print("KERNEL_OK")
    else:
        print(f"MISMATCH max_err={max_err}")
</pallas_src>

<mosaic_0001>
module attributes {stable_mosaic.version = 11 : i64} {
  func.func @_warp_kernel(%arg0: i32, %arg1: i32, %arg2: memref<1x2x256xf32, #tpu.memory_space<vmem>>, %arg3: memref<1x64x16xf32, #tpu.memory_space<vmem>>, %arg4: memref<1x4x256xf32, #tpu.memory_space<vmem>>) attributes {dimension_semantics = [#tpu.dimension_semantics<parallel>, #tpu.dimension_semantics<parallel>], iteration_bounds = array<i64: 2, 1>, scalar_prefetch = 0 : i64, scratch_operands = 0 : i64, tpu.core_type = #tpu.core_type<tc>, window_params = [{transform_indices = @transform_0, window_bounds = array<i64: 1, 2, 256>}, {transform_indices = @transform_1, window_bounds = array<i64: 1, 64, 16>}, {transform_indices = @transform_2, window_bounds = array<i64: 1, 4, 256>}]} {
    %c0 = arith.constant 0 : index
    %c0_0 = arith.constant 0 : index
    %c0_1 = arith.constant 0 : index
    %0 = vector.load %arg2[%c0, %c0_0, %c0_1] : memref<1x2x256xf32, #tpu.memory_space<vmem>>, vector<1x2x256xf32>
    %1 = vector.extract_strided_slice %0 {offsets = [0, 0, 0], sizes = [1, 1, 256], strides = [1, 1, 1]} : vector<1x2x256xf32> to vector<1x1x256xf32>
    %2 = vector.extract_strided_slice %0 {offsets = [0, 1, 0], sizes = [1, 1, 256], strides = [1, 1, 1]} : vector<1x2x256xf32> to vector<1x1x256xf32>
    %3 = math.floor %1 : vector<1x1x256xf32>
    %cst = arith.constant -2.000000e+00 : f32
    %cst_2 = arith.constant 1.700000e+01 : f32
    %4 = vector.broadcast %cst : f32 to vector<1x1x256xf32>
    %5 = arith.maximumf %4, %3 : vector<1x1x256xf32>
    %6 = vector.broadcast %cst_2 : f32 to vector<1x1x256xf32>
    %7 = arith.minimumf %6, %5 : vector<1x1x256xf32>
    %8 = math.floor %2 : vector<1x1x256xf32>
    %cst_3 = arith.constant -2.000000e+00 : f32
    %cst_4 = arith.constant 1.700000e+01 : f32
    %9 = vector.broadcast %cst_3 : f32 to vector<1x1x256xf32>
    %10 = arith.maximumf %9, %8 : vector<1x1x256xf32>
    %11 = vector.broadcast %cst_4 : f32 to vector<1x1x256xf32>
    %12 = arith.minimumf %11, %10 : vector<1x1x256xf32>
    %cst_5 = arith.constant 1.000000e+00 : f32
    %13 = vector.broadcast %cst_5 : f32 to vector<1x1x256xf32>
    %14 = arith.addf %7, %13 : vector<1x1x256xf32>
    %15 = arith.subf %14, %1 : vector<1x1x256xf32>
    %cst_6 = arith.constant 1.000000e+00 : f32
    %16 = vector.broadcast %cst_6 : f32 to vector<1x1x256xf32>
    %17 = arith.addf %12, %16 : vector<1x1x256xf32>
    %18 = arith.subf %17, %2 : vector<1x1x256xf32>
    %19 = arith.fptosi %7 : vector<1x1x256xf32> to vector<1x1x256xi32>
    %20 = arith.fptosi %12 : vector<1x1x256xf32> to vector<1x1x256xi32>
    %21 = tpu.iota {dimensions = array<i32: 1>} : vector<1x16x1xi32>
    %22 = vector.broadcast %21 : vector<1x16x1xi32> to vector<1x16x256xi32>
    %23 = vector.broadcast %20 : vector<1x1x256xi32> to vector<1x16x256xi32>
    %24 = arith.cmpi eq, %22, %23 : vector<1x16x256xi32>
    %cst_7 = arith.constant 0.000000e+00 : f32
    %25 = vector.shape_cast %18 : vector<1x1x256xf32> to vector<1x1x256xf32>
    %26 = vector.broadcast %25 : vector<1x1x256xf32> to vector<1x16x256xf32>
    %27 = vector.broadcast %cst_7 : f32 to vector<1x16x256xf32>
    %28 = arith.select %24, %26, %27 : vector<1x16x256xi1>, vector<1x16x256xf32>
    %c1_i32 = arith.constant 1 : i32
    %29 = vector.broadcast %c1_i32 : i32 to vector<1x1x256xi32>
    %30 = arith.addi %20, %29 : vector<1x1x256xi32>
    %31 = vector.broadcast %21 : vector<1x16x1xi32> to vector<1x16x256xi32>
    %32 = vector.broadcast %30 : vector<1x1x256xi32> to vector<1x16x256xi32>
    %33 = arith.cmpi eq, %31, %32 : vector<1x16x256xi32>
    %cst_8 = arith.constant 1.000000e+00 : f32
    %34 = vector.broadcast %cst_8 : f32 to vector<1x1x256xf32>
    %35 = arith.subf %34, %18 : vector<1x1x256xf32>
    %cst_9 = arith.constant 0.000000e+00 : f32
    %36 = vector.shape_cast %35 : vector<1x1x256xf32> to vector<1x1x256xf32>
    %37 = vector.broadcast %36 : vector<1x1x256xf32> to vector<1x16x256xf32>
    %38 = vector.broadcast %cst_9 : f32 to vector<1x16x256xf32>
    %39 = arith.select %33, %37, %38 : vector<1x16x256xi1>, vector<1x16x256xf32>
    %40 = arith.addf %28, %39 : vector<1x16x256xf32>
    %c0_10 = arith.constant 0 : index
    %c0_11 = arith.constant 0 : index
    %c0_12 = arith.constant 0 : index
    %41 = vector.load %arg3[%c0_10, %c0_11, %c0_12] : memref<1x64x16xf32, #tpu.memory_space<vmem>>, vector<1x64x16xf32>
    "tpu.trace_start"() <{level = 10 : i32, message = "bky,byt->bkt"}> : () -> ()
    %cst_13 = arith.constant dense<0.000000e+00> : vector<1x64x256xf32>
    %42 = tpu.matmul %41, %40, %cst_13 {dimension_numbers = #tpu.dot_dimension_numbers<[2], [1], [1], [2], [0, 0, 0, 1, 1, 2], [0], [0]>} : vector<1x64x16xf32>, vector<1x16x256xf32>, vector<1x64x256xf32> -> vector<1x64x256xf32>
    "tpu.trace_stop"() : () -> ()
    %43 = tpu.iota {dimensions = array<i32: 2>} : vector<1x1x16x1xi32>
    %44 = vector.shape_cast %19 : vector<1x1x256xi32> to vector<1x1x1x256xi32>
    %45 = vector.shape_cast %15 : vector<1x1x256xf32> to vector<1x1x1x256xf32>
    %46 = vector.broadcast %43 : vector<1x1x16x1xi32> to vector<1x1x16x256xi32>
    %47 = vector.broadcast %44 : vector<1x1x1x256xi32> to vector<1x1x16x256xi32>
    %48 = arith.cmpi eq, %46, %47 : vector<1x1x16x256xi32>
    %cst_14 = arith.constant 0.000000e+00 : f32
    %49 = vector.shape_cast %45 : vector<1x1x1x256xf32> to vector<1x1x1x256xf32>
    %50 = vector.broadcast %49 : vector<1x1x1x256xf32> to vector<1x1x16x256xf32>
    %51 = vector.broadcast %cst_14 : f32 to vector<1x1x16x256xf32>
    %52 = arith.select %48, %50, %51 : vector<1x1x16x256xi1>, vector<1x1x16x256xf32>
    %c1_i32_15 = arith.constant 1 : i32
    %53 = vector.broadcast %c1_i32_15 : i32 to vector<1x1x1x256xi32>
    %54 = arith.addi %44, %53 : vector<1x1x1x256xi32>
    %55 = vector.broadcast %43 : vector<1x1x16x1xi32> to vector<1x1x16x256xi32>
    %56 = vector.broadcast %54 : vector<1x1x1x256xi32> to vector<1x1x16x256xi32>
    %57 = arith.cmpi eq, %55, %56 : vector<1x1x16x256xi32>
    %cst_16 = arith.constant 1.000000e+00 : f32
    %58 = vector.broadcast %cst_16 : f32 to vector<1x1x1x256xf32>
    %59 = arith.subf %58, %45 : vector<1x1x1x256xf32>
    %cst_17 = arith.constant 0.000000e+00 : f32
    %60 = vector.shape_cast %59 : vector<1x1x1x256xf32> to vector<1x1x1x256xf32>
    %61 = vector.broadcast %60 : vector<1x1x1x256xf32> to vector<1x1x16x256xf32>
    %62 = vector.broadcast %cst_17 : f32 to vector<1x1x16x256xf32>
    %63 = arith.select %57, %61, %62 : vector<1x1x16x256xi1>, vector<1x1x16x256xf32>
    %64 = arith.addf %52, %63 : vector<1x1x16x256xf32>
    %65 = vector.shape_cast %42 : vector<1x64x256xf32> to vector<1x4x16x256xf32>
    %66 = vector.broadcast %64 : vector<1x1x16x256xf32> to vector<1x4x16x256xf32>
    %67 = arith.mulf %65, %66 : vector<1x4x16x256xf32>
    %cst_18 = arith.constant dense<0.000000e+00> : vector<1x4x256xf32>
    %68 = vector.multi_reduction <add>, %67, %cst_18 [2] : vector<1x4x16x256xf32> to vector<1x4x256xf32>
    %c0_19 = arith.constant 0 : index
    %c0_20 = arith.constant 0 : index
    %c0_21 = arith.constant 0 : index
    %69 = vector.load %arg4[%c0_19, %c0_20, %c0_21] : memref<1x4x256xf32, #tpu.memory_space<vmem>>, vector<1x4x256xf32>
    tpu.vector_store %arg4[%c0_19, %c0_20, %c0_21], %68 {strides = array<i32>} : memref<1x4x256xf32, #tpu.memory_space<vmem>>, vector<1x4x256xf32>,
    return
  }
  func.func @transform_0(%arg0: i32, %arg1: i32) -> (i32, i32, i32) {
    %c0_i32 = arith.constant 0 : i32
    %c0_i32_0 = arith.constant 0 : i32
    return %arg0, %c0_i32, %arg1 : i32, i32, i32
  }
  func.func @transform_1(%arg0: i32, %arg1: i32) -> (i32, i32, i32) {
    %c0_i32 = arith.constant 0 : i32
    %c0_i32_0 = arith.constant 0 : i32
    %c0_i32_1 = arith.constant 0 : i32
    return %arg0, %c0_i32, %c0_i32_0 : i32, i32, i32
  }
  func.func @transform_2(%arg0: i32, %arg1: i32) -> (i32, i32, i32) {
    %c0_i32 = arith.constant 0 : i32
    %c0_i32_0 = arith.constant 0 : i32
    return %arg0, %c0_i32, %arg1 : i32, i32, i32
  }
}

</mosaic_0001>

<bundles_post_ra>
// kernel: tpu_custom_call.1
= control target key start
LH: loop header
LB: loop body
LE: loop exit
PB: predicated region body
PF: predicated region fallthrough
CT: control target
= control target key end

     0   :  { %7 = vsyncpa [#allocation3], 0  ;;  %s1111_s0 = inlined_call_operand.vmem [shape: f32[2,2,256], index: 0, kind: input, shape index: {}]   ;;  %s1112_s1 = inlined_call_operand.vmem [shape: f32[2,64,16], index: 1, kind: input, shape index: {}]   ;;  %s1113_s2 = inlined_call_operand.hbm [shape: f32[2,4,256], index: 2, kind: output, shape index: {}]  }
   0x1   :  { %9 = vsyncpa [#allocation3 + $0x1], 0  ;;  %s918_s9 = smov 0   ;;  %s920_s10 = smov 0  }
   0x2   :  { %s922_s11 = smov 0   ;;  %s924_s12 = smov 0  }
   0x3   :  { %s926_s13 = smov 0   ;;  %s928_s14 = smov 0  }
   0x4 LB: > { %s735_s15 = sadd.s32 4294967295, %s899_s14   ;;  %s736_s16 = sadd.s32 4294967294, %s899_s14   ;;  %s899_s14 = sphi %s928_s14, %s15_s14   ;;  %s895_s13 = sphi %s926_s13, %s1120_s13   ;;  %s891_s12 = sphi %s924_s12, %s1119_s12   ;;  %s887_s11 = sphi %s922_s11, %s1118_s11   ;;  %s883_s10 = sphi %s920_s10, %s1117_s10   ;;  %s879_s9 = sphi %s918_s9, %s1116_s9  }
   0x5   : > { %s27_s17 = sadd.s32 1, %s895_s13  ;;  %s90_s18 = sadd.s32 1, %s887_s11 }
   0x6   : > { %p29_p0 = scmp.ge.s32.totalorder %s27_s17, 2  ;;  %p100_p1 = scmp.ne.s32.totalorder %s887_s11, %s883_s10 }
   0x7   : > { %p101_p2 = scmp.eq.s32.totalorder %s735_s15, 1  ;;  %p106_p3 = scmp.ne.s32.totalorder %s883_s10, %s879_s9 }
   0x8   : > { %s1122_s17 = smov (%p29_p0, %s27_s17), 0  ;;  %p107_p5 = scmp.eq.s32.totalorder %s736_s16, 1 }
   0x9   : > { %p958_p4 = por %p101_p2, %p100_p1  ;;  %s85_s20 = ssub.s32 %s895_s13, %s1122_s17 }
   0xa   : > { %p739_p6 = scmp.ge.s32.totalorder %s899_s14, 1  ;;  %p88_p7 = scmp.eq.s32.totalorder %s85_s20, 0 }
   0xb   : > { %p965_p8 = por %p107_p5, %p106_p3  ;;  %p146_p9 = scmp.lt.s32.totalorder %s899_s14, 3 }
   0xc   : > { %s971_s22 = scalar_select %p88_p7, %s887_s11, %s90_s18  }
   0xd   : > { %p147_p10 = pnand %p739_p6, %p146_p9 }
   0xe   : > { %p178_p11 = scmp.lt.s32.totalorder (!%p147_p10), %s891_s12, 1  ;;  %s174_s4 = sand.u32 (!%p147_p10), 1, %s883_s10  }
   0xf   : > { %150 = sbr.rel (%p147_p10) target bundleno = 295 (0x127), region = 28  ;;  %s740_s5 = sshll.u32 (!%p147_p10), %s174_s4, 3 }
  0x10   : > { %s760_s6 = sshll.u32 (!%p147_p10), %s891_s12, 7  ;;  %s176_s7 = scalar_lea.vmem (!%p147_p10), [#allocation2], %s740_s5 }
  0x11   : > { %s647_s8 = sshll.u32 (!%p147_p10), %s176_s7, 4  ;;  %s1069_s18 = scalar_lea.hbm (!%p147_p10), %s1113_s2, %s760_s6  ;;  %s648_s8 = int_to_ptr.vmem [resolvable:$true] %s647_s8 }
  0x12   : > { %s631_s20 = scalar_lea.sflag (!%p147_p10), [#allocation3], %s174_s4 }
  0x14   : > { %v901_v0 = vmov 0.0   ;;  %s977_s23 = scalar_select %p178_p11, %s891_s12, 1  ;;  %v200_v1 = vlaneseq  ;;  %vm303_vm8 = vcmask 130048  }
  0x15   : > { %392 = vmatprep.mubr.f32.mxu0 %v901_v0  ;;  %416 = vmatprep.mubr.f32.mxu1 %v901_v0  ;;  %s902_s12 = smov [#allocation2]  }
  0x16   : > { %s758_s24 = sshll.u32 %s977_s23, 2  ;;  %v983_v5 = vshrl.u32 %v200_v1, 7  ;;  %s759_s28 = sshll.u32 %s977_s23, 6 }
  0x17   : > { %s185_s27 = scalar_lea.vmem %s1111_s0, %s758_s24  ;;  %s1019_s3 = scalar_lea.vmem %s1112_s1, %s759_s28 }
  0x18   : > { %v193_v2 = vld [vmem:[%s185_s27] sm:$0xf]  ;;  %v209_v9 = vsub.s32 3, %v983_v5  ;;  %v205_v10 = vsub.s32 1, %v983_v5  ;;  %v992_v13 = vadd.s32 8, %v983_v5  ;;  %v296_v46 = vld [vmem:[%s1019_s3 + $0x8] sm:$0xff] }
  0x19   : > { %v194_v3 = vfloor.f32 %v193_v2  ;;  %v295_v44 = vld [vmem:[%s1019_s3] sm:$0xff]  ;;  %v300_v47 = vld [vmem:[%s1019_s3 + $0x28] sm:$0xff]  ;;  %v297_v48 = vld [vmem:[%s1019_s3 + $0x10] sm:$0xff]  ;;  %v443_v52 = vsub.s32 0, %v983_v5  ;;  %v447_v53 = vsub.s32 2, %v983_v5  ;;  %s823_s23 = scalar_lea.vmem %s648_s8, 128 }
  0x1a   : > { %v299_v45 = vld [vmem:[%s1019_s3 + $0x20] sm:$0xff]  ;;  %v301_v49 = vld [vmem:[%s1019_s3 + $0x30] sm:$0xff]  ;;  %v298_v50 = vld [vmem:[%s1019_s3 + $0x18] sm:$0xff]  ;;  %p824_p12 = scmp.ne.s32.totalorder %s648_s8, %s823_s23  ;;  %s827_s24 = sshll.u32 %s902_s12, 4  ;;  %s828_s24 = int_to_ptr.vmem [resolvable:$false] %s827_s24 }
  0x1b   : > { %v195_v4 = vmax.f32 %v194_v3, -2.0  ;;  %v302_v51 = vld [vmem:[%s1019_s3 + $0x38] sm:$0xff]  ;;  %s829_s25 = scalar_lea.vmem %s828_s24, 256  ;;  %p830_p1 = scmp.lt.s32.totalorder %s648_s8, %s828_s24 }
  0x1c   : > { %p825_p13 = pnand %p824_p12, %p958_p4  ;;  %p831_p2 = scmp.lt.s32.totalorder %s829_s25, %s823_s23 }
  0x1d   : > { %v196_v6 = vmin.f32 %v195_v4, 17.0 }
  0x1e   : > { %p826_p0 = pneg %p825_p13  ;;  %p832_p3 = por %p831_p2, %p830_p1 }
  0x1f   : > { %v197_v7 = vadd.f32 1.0, %v196_v6  ;;  %v765_v8 = vtrunc.f32 %v196_v6 }
  0x20   : > { %p833_p5 = pnand %p832_p3, %p826_p0 }
  0x21   : > { %v987_v11 = vsub.f32 %v197_v7, %v193_v2  ;;  %v989_v12 = vcvt.f32.s32 %v765_v8 }
  0x23   : > { %v210_v14 = vrot.slane %v989_v12, %v209_v9  ;;  %v231_v15 = vrot.slane %v987_v11, %v209_v9  ;;  %v997_v16 = vadd.s32 1, %v989_v12  ;;  %v1000_v17 = vsub.f32 1.0, %v987_v11 }
  0x24   : > { %v206_v18 = vrot.slane %v989_v12, %v205_v10  ;;  %v227_v19 = vrot.slane %v987_v11, %v205_v10  ;;  %v444_v54 = vrot.slane %v989_v12, %v443_v52  ;;  %v448_v56 = vrot.slane %v989_v12, %v447_v53 }
  0x25   : > { %v218_v20 = vrot.slane %v210_v14, %v205_v10  ;;  %v241_v21 = vrot.slane %v231_v15, %v205_v10  ;;  %v254_v22 = vrot.slane %v997_v16, %v209_v9  ;;  %v276_v23 = vrot.slane %v1000_v17, %v209_v9 }
  0x26   : > { %v214_v24 = vrot.slane %v206_v18, %v205_v10  ;;  %v237_v25 = vrot.slane %v227_v19, %v205_v10  ;;  %v250_v26 = vrot.slane %v997_v16, %v205_v10  ;;  %v272_v27 = vrot.slane %v1000_v17, %v205_v10 }
  0x27   : > { %vm222_vm0 = vcmp.eq.s32.totalorder %v992_v13, %v218_v20  ;;  %v262_v28 = vrot.slane %v254_v22, %v205_v10  ;;  %v286_v29 = vrot.slane %v276_v23, %v205_v10  ;;  %vm220_vm1 = vcmp.eq.s32.totalorder %v983_v5, %v218_v20 }
  0x28   : > { %v245_v30 = vsel %vm222_vm0, %v241_v21, 0.0  ;;  %vm221_vm2 = vcmp.eq.s32.totalorder %v992_v13, %v214_v24  ;;  %v258_v31 = vrot.slane %v250_v26, %v205_v10  ;;  %v282_v32 = vrot.slane %v272_v27, %v205_v10 }
  0x29   : > { %vm266_vm3 = vcmp.eq.s32.totalorder %v992_v13, %v262_v28  ;;  %v244_v33 = vsel %vm221_vm2, %v237_v25, 0.0  ;;  %v243_v34 = vsel %vm220_vm1, %v241_v21, 0.0  ;;  %vm264_vm4 = vcmp.eq.s32.totalorder %v983_v5, %v262_v28 }
  0x2a   : > { %v290_v35 = vsel %vm266_vm3, %v286_v29, 0.0  ;;  %vm265_vm5 = vcmp.eq.s32.totalorder %v992_v13, %v258_v31  ;;  %v288_v36 = vsel %vm264_vm4, %v286_v29, 0.0  ;;  %vm219_vm6 = vcmp.eq.s32.totalorder %v983_v5, %v214_v24 }
  0x2b   : > { %v294_v37 = vadd.f32 %v290_v35, %v245_v30  ;;  %v289_v38 = vsel %vm265_vm5, %v282_v32, 0.0  ;;  %v292_v39 = vadd.f32 %v288_v36, %v243_v34  ;;  %v242_v40 = vsel %vm219_vm6, %v237_v25, 0.0 }
  0x2c   : > { %v293_v41 = vadd.f32 %v289_v38, %v244_v33  ;;  %vm263_vm7 = vcmp.eq.s32.totalorder %v983_v5, %v258_v31  ;;  %v486_v55 = vrot.slane %v997_v16, %v443_v52  ;;  %v490_v57 = vrot.slane %v997_v16, %v447_v53 }
  0x2d   : > { %356 = vmatprep.subr.mxu0 %v294_v37  ;;  %761 = vmatprep.subr.mxu1 %v294_v37  ;;  %v287_v42 = vsel %vm263_vm7, %v282_v32, 0.0  ;;  %v452_v58 = vrot.slane %v444_v54, %v443_v52  ;;  %v464_v59 = vrot.slane %v987_v11, %v443_v52  ;;  %v506_v61 = vrot.slane %v1000_v17, %v443_v52 }
  0x2e   : > { %357 = vmatpush1.msra.mxu0 %v293_v41  ;;  %763 = vmatpush1.msra.mxu1 %v293_v41  ;;  %v291_v43 = vadd.f32 %v287_v42, %v242_v40  ;;  %v494_v60 = vrot.slane %v486_v55, %v443_v52  ;;  %v468_v62 = vrot.slane %v987_v11, %v447_v53  ;;  %vm614_vm1 = vcmask 1041409  }
  0x2f   : > { %358 = vmatprep.subr.mxu0 %v292_v39  ;;  %762 = vmatprep.subr.mxu1 %v292_v39  ;;  %v510_v63 = vrot.slane %v1000_v17, %v447_v53  ;;  %v498_v1 = vrot.slane %v490_v57, %v443_v52  ;;  %vm457_vm9 = vcmp.eq.s32.totalorder %v983_v5, %v452_v58  ;;  %vm616_vm2 = vcmask 1045509  }
  0x30   : > { %359 = vmatpush1.msra.mxu0 %v291_v43  ;;  %764 = vmatpush1.msra.mxu1 %v291_v43  ;;  %v474_v2 = vrot.slane %v464_v59, %v443_v52  ;;  %vm499_vm10 = vcmp.eq.s32.totalorder %v983_v5, %v494_v60  ;;  %v516_v3 = vrot.slane %v506_v61, %v443_v52  ;;  %vm619_vm3 = vcmask 1042434  }
  0x31   : > { %745 = vmatmul.mubr.msk.f32.vlgmr.msra.gmra.mxu0 %vm303_vm8, %v295_v44  ;;  %749 = vmatmul.mubr.msk.f32.vlgmr.msra.gmra.mxu1 %vm303_vm8, %v299_v45  ;;  %v478_v4 = vrot.slane %v468_v62, %v443_v52  ;;  %v520_v6 = vrot.slane %v510_v63, %v443_v52  ;;  %vm459_vm11 = vcmp.eq.s32.totalorder %v992_v13, %v452_v58  ;;  %vm621_vm4 = vcmask 1046534  }
  0x32   : > { %398 = vmatprep.mubr.f32.mxu0 %v901_v0  ;;  %422 = vmatprep.mubr.f32.mxu1 %v901_v0  ;;  %vm501_vm12 = vcmp.eq.s32.totalorder %v992_v13, %v494_v60  ;;  %vm500_vm14 = vcmp.eq.s32.totalorder %v983_v5, %v498_v1  ;;  %vm502_vm0 = vcmp.eq.s32.totalorder %v992_v13, %v498_v1  ;;  %v479_v7 = vsel %vm457_vm9, %v474_v2, 0.0 }
  0x33   : > { %v521_v8 = vsel %vm499_vm10, %v516_v3, 0.0  ;;  %v481_v9 = vsel %vm459_vm11, %v474_v2, 0.0  ;;  %v523_v10 = vsel %vm501_vm12, %v516_v3, 0.0  ;;  %v522_v12 = vsel %vm500_vm14, %v520_v6, 0.0 }
  0x34   : > { %v524_v17 = vsel %vm502_vm0, %v520_v6, 0.0  ;;  %v525_v18 = vadd.f32 %v521_v8, %v479_v7  ;;  %v527_v19 = vadd.f32 %v523_v10, %v481_v9  ;;  %vm624_vm5 = vcmask 1043459  }
  0x35   : > { %746 = vmatmul.mubr.msk.f32.gmra.mxu0 %vm303_vm8, %v296_v46  ;;  %750 = vmatmul.mubr.msk.f32.gmra.mxu1 %vm303_vm8, %v300_v47  ;;  %vm626_vm6 = vcmask 1047559  }
  0x36   : > { %404 = vmatprep.mubr.f32.mxu0 %v901_v0  ;;  %428 = vmatprep.mubr.f32.mxu1 %v901_v0 }
  0x39   : > { %747 = vmatmul.mubr.msk.f32.gmra.mxu0 %vm303_vm8, %v297_v48  ;;  %751 = vmatmul.mubr.msk.f32.gmra.mxu1 %vm303_vm8, %v301_v49 }
  0x3a   : > { %410 = vmatprep.mubr.f32.mxu0 %v901_v0  ;;  %434 = vmatprep.mubr.f32.mxu1 %v901_v0  ;;  %v456_v0 = vrot.slane %v448_v56, %v443_v52 }
  0x3c   : > { %vm458_vm13 = vcmp.eq.s32.totalorder %v983_v5, %v456_v0  ;;  %vm460_vm15 = vcmp.eq.s32.totalorder %v992_v13, %v456_v0 }
  0x3d   : > { %748 = vmatmul.mubr.msk.f32.gmra.mxu0 %vm303_vm8, %v298_v50  ;;  %752 = vmatmul.mubr.msk.f32.gmra.mxu1 %vm303_vm8, %v302_v51  ;;  %v480_v11 = vsel %vm458_vm13, %v478_v4, 0.0  ;;  %v482_v16 = vsel %vm460_vm15, %v478_v4, 0.0 }
  0x3e   : > { %v526_v21 = vadd.f32 %v522_v12, %v480_v11  ;;  %v528_v23 = vadd.f32 %v524_v17, %v482_v16 }
  0xf1   : > { %v394_v14 = vpop.f32.mrf.mxu0  ;;  %v418_v15 = vpop.f32.mrf.mxu1 }
  0xf2   : > { %v537_v5 = vmul.f32 %v525_v18, %v418_v15  ;;  %v529_v13 = vmul.f32 %v525_v18, %v394_v14 }
  0xf3   : > { %v396_v20 = vpop.f32.mrf.mxu0  ;;  %v420_v22 = vpop.f32.mrf.mxu1 }
  0xf4   : > { %v530_v28 = vmul.f32 %v526_v21, %v396_v20  ;;  %v538_v29 = vmul.f32 %v526_v21, %v420_v22 }
  0xf5   : > { %v400_v24 = vpop.f32.mrf.mxu0  ;;  %v424_v25 = vpop.f32.mrf.mxu1 }
  0xf6   : > { %v531_v26 = vmul.f32 %v527_v19, %v400_v24  ;;  %v539_v27 = vmul.f32 %v527_v19, %v424_v25 }
  0xf7   : > { %v402_v30 = vpop.f32.mrf.mxu0  ;;  %v426_v31 = vpop.f32.mrf.mxu1 }
  0xf8   : > { %v545_v32 = vadd.f32 %v531_v26, %v529_v13  ;;  %v573_v33 = vadd.f32 %v539_v27, %v537_v5  ;;  %v532_v34 = vmul.f32 %v528_v23, %v402_v30  ;;  %v540_v35 = vmul.f32 %v528_v23, %v426_v31 }
  0xf9   : > { %v406_v36 = vpop.f32.mrf.mxu0  ;;  %v430_v37 = vpop.f32.mrf.mxu1 }
  0xfa   : > { %v574_v38 = vrot.slane %v573_v33, 4  ;;  %v552_v39 = vadd.f32 %v532_v34, %v530_v28  ;;  %v580_v40 = vadd.f32 %v540_v35, %v538_v29  ;;  %v546_v43 = vrot.slane %v545_v32, 4 }
  0xfb   : > { %v408_v41 = vpop.f32.mrf.mxu0  ;;  %v432_v42 = vpop.f32.mrf.mxu1  ;;  %v541_v46 = vmul.f32 %v525_v18, %v430_v37  ;;  %v533_v52 = vmul.f32 %v525_v18, %v406_v36 }
  0xfc   : > { %v553_v44 = vrot.slane %v552_v39, 4  ;;  %v581_v45 = vrot.slane %v580_v40, 4  ;;  %v575_v49 = vadd.f32 %v574_v38, %v573_v33  ;;  %v547_v57 = vadd.f32 %v546_v43, %v545_v32 }
  0xfd   : > { %v412_v47 = vpop.f32.mrf.mxu0  ;;  %v436_v48 = vpop.f32.mrf.mxu1  ;;  %v534_v59 = vmul.f32 %v526_v21, %v408_v41  ;;  %v542_v60 = vmul.f32 %v526_v21, %v432_v42 }
  0xfe   : > { %v554_v50 = vadd.f32 %v553_v44, %v552_v39  ;;  %v582_v51 = vadd.f32 %v581_v45, %v580_v40  ;;  %v535_v53 = vmul.f32 %v527_v19, %v412_v47  ;;  %v543_v54 = vmul.f32 %v527_v19, %v436_v48 }
  0xff   : > { %v414_v55 = vpop.f32.mrf.mxu0  ;;  %v438_v56 = vpop.f32.mrf.mxu1  ;;  %v576_v1 = vrot.slane %v575_v49, 2  ;;  %v548_v8 = vrot.slane %v547_v57, 2 }
 0x100   : > { %v583_v58 = vrot.slane %v582_v51, 2  ;;  %v559_v61 = vadd.f32 %v535_v53, %v533_v52  ;;  %v587_v62 = vadd.f32 %v543_v54, %v541_v46  ;;  %v536_v63 = vmul.f32 %v528_v23, %v414_v55 }
 0x101   : > { %v544_v0 = vmul.f32 %v528_v23, %v438_v56  ;;  %v555_v2 = vrot.slane %v554_v50, 2  ;;  %v577_v15 = vadd.f32 %v576_v1, %v575_v49  ;;  %v549_v21 = vadd.f32 %v548_v8, %v547_v57 }
 0x102   : > { %v560_v3 = vrot.slane %v559_v61, 4  ;;  %v588_v4 = vrot.slane %v587_v62, 4  ;;  %v566_v6 = vadd.f32 %v536_v63, %v534_v59  ;;  %v584_v9 = vadd.f32 %v583_v58, %v582_v51 }
 0x103   : > { %v594_v7 = vadd.f32 %v544_v0, %v542_v60  ;;  %v556_v16 = vadd.f32 %v555_v2, %v554_v50  ;;  %v578_v13 = vrot.slane %v577_v15, 1  ;;  %v550_v30 = vrot.slane %v549_v21, 1 }
 0x104   : > { %v561_v10 = vadd.f32 %v560_v3, %v559_v61  ;;  %v589_v11 = vadd.f32 %v588_v4, %v587_v62  ;;  %v567_v12 = vrot.slane %v566_v6, 4  ;;  %v585_v22 = vrot.slane %v584_v9, 1 }
 0x105   : > { %v595_v14 = vrot.slane %v594_v7, 4  ;;  %v557_v26 = vrot.slane %v556_v16, 1  ;;  %v579_v35 = vadd.f32 %v578_v13, %v577_v15  ;;  %v551_v40 = vadd.f32 %v550_v30, %v549_v21 }
 0x106   : > { %v562_v17 = vrot.slane %v561_v10, 2  ;;  %v590_v18 = vrot.slane %v589_v11, 2  ;;  %v568_v19 = vadd.f32 %v567_v12, %v566_v6  ;;  %v586_v31 = vadd.f32 %v585_v22, %v584_v9 }
 0x107   : > { %v596_v20 = vadd.f32 %v595_v14, %v594_v7  ;;  %v558_v36 = vadd.f32 %v557_v26, %v556_v16 }
 0x108   : > { %v563_v5 = vadd.f32 %v562_v17, %v561_v10  ;;  %v591_v23 = vadd.f32 %v590_v18, %v589_v11  ;;  %v569_v24 = vrot.slane %v568_v19, 2  ;;  %v611_v41 = vcombine.low %v579_v35, %v586_v31 }
 0x109   : > { %v597_v25 = vrot.slane %v596_v20, 2  ;;  %v609_v44 = vcombine.low %v551_v40, %v558_v36 }
 0x10a   : > { %v564_v27 = vrot.slane %v563_v5, 1  ;;  %v570_v28 = vadd.f32 %v569_v24, %v568_v19  ;;  %v592_v32 = vrot.slane %v591_v23, 1  ;;  %v618_v47 = vrot.slane %v611_v41, 6 }
 0x10b   : > { %v598_v29 = vadd.f32 %v597_v25, %v596_v20 }
 0x10c   : > { %v571_v33 = vrot.slane %v570_v28, 1  ;;  %v565_v37 = vadd.f32 %v564_v27, %v563_v5  ;;  %v593_v42 = vadd.f32 %v592_v32, %v591_v23 }
 0x10d   : > { %v599_v34 = vrot.slane %v598_v29, 1 }
 0x10e   : > { %v572_v38 = vadd.f32 %v571_v33, %v570_v28 }
 0x10f   : > { %v600_v39 = vadd.f32 %v599_v34, %v598_v29 }
 0x110   : > { %v610_v43 = vcombine.low %v565_v37, %v572_v38 }
 0x111   : > { %v612_v46 = vcombine.low %v593_v42, %v600_v39 }
 0x112   : > { %v613_v45 = vrot.slane %v610_v43, 7 }
 0x113   : > { %v623_v51 = vrot.slane %v612_v46, 5 }
 0x114   : > { %v615_v48 = vsel %vm614_vm1, %v613_v45, %v609_v44 }
 0x115   : > { %v617_v49 = vsel %vm616_vm2, %v613_v45, %v615_v48 }
 0x116   : > { %v620_v50 = vsel %vm619_vm3, %v618_v47, %v617_v49 }
 0x117   : > { %v622_v52 = vsel %vm621_vm4, %v618_v47, %v620_v50 }
 0x118   : > { %v625_v53 = vsel %vm624_vm5, %v623_v51, %v622_v52 }
 0x119   : > { %v627_v54 = vsel %vm626_vm6, %v623_v51, %v625_v53 }
 0x11a   : > { %629 = vst [vmem:[%s176_s7] sm:$0xff] %v627_v54 }
 0x11b   : > { %836 = shalt.err (!%p833_p5)
}
 0x11c   : > { %s837_s26 = scalar_lea.hbm %s1069_s18, 128  ;;  %s841_s29 = scalar_lea.hbm %s1113_s2, 256 }
 0x11d   : > { %p838_p6 = scmp.ne.s32.totalorder %s1069_s18, %s837_s26  ;;  %p842_p10 = scmp.lt.s32.totalorder %s1069_s18, %s1113_s2 }
 0x11e   : > { %p843_p11 = scmp.lt.s32.totalorder %s841_s29, %s837_s26 }
 0x11f   : > { %p839_p7 = pnand %p838_p6, %p958_p4 }
 0x120   : > { %p844_p12 = por %p843_p11, %p842_p10 }
 0x121   : > { %p840_p9 = pneg %p839_p7 }
 0x123   : > { %p845_p13 = pnand %p844_p12, %p840_p9 }
 0x125   : > { %848 = shalt.err (!%p845_p13)
}
 0x126   : > { %767 = dma.vmem_to_hbm [thread:$0]  (%p958_p4), %s648_s8, 128, %s1069_s18, %s631_s20  }
 0x127 PF: > { %p773_p0 = scmp.ge.s32.totalorder %s899_s14, 2  ;;  %s659_s4 = sand.u32 1, %s879_s9  }
 0x128   : > { %s660_s5 = scalar_lea.sflag [#allocation3], %s659_s4 }
 0x129   : > { %p770_p1 = pnand %p773_p0, %p965_p8 }
 0x12b   : > { %p771_p2 = pneg %p770_p1 }
 0x12d   : > { %874 = dma.done.wait (%p771_p2), %s660_s5, 128  }
 0x12e   : > { %876 = vsyncadd (%p771_p2), %s660_s5, 4294967168  ;;  %s15_s14 = sadd.s32 1, %s899_s14   ;;  %s1116_s9 = smov %s883_s10 }
 0x12f   : > { %p12_p3 = scmp.ge.s32.totalorder %s15_s14, 4   ;;  %s1117_s10 = smov %s887_s11 }
 0x130   : > { %s1118_s11 = smov %s971_s22  ;;  %s1119_s12 = smov %s895_s13 }
 0x131   : > { %s1120_s13 = smov %s1122_s17  ;;  %14 = sbr.rel (!%p12_p3) target bundleno = 4 (0x4), region = 66 }
 0x136   :  { %665 = vsyncpa [#allocation3], 1 }
 0x137   :  { %667 = vsyncpa [#allocation3 + $0x1], 1 }

</bundles_post_ra>
